<compile_context>
chip_gen: v5e
topology: v5e:2x2
jax: 0.10.0
libtpu: 0.0.40
codegen_flags: <defaults>
</compile_context>

<pallas_src>
import jax
import jax.numpy as jnp
from jax import lax
from jax.experimental import pallas as pl
from jax.experimental.pallas import tpu as pltpu

_LANES = 128      # vreg lane width
_SUBLANES = 8     # vreg sublane depth
_ROW_TILE = 64    # rows of 128 ids per grid step (64*128 = 8192 ids, ~32 KiB/block)


def _embed_exp_kernel(ids_ref, weight_ref, out_ref):
    # ids_ref:    [row_tile, 128] int32   (lane-dense participant ids, VMEM)
    # weight_ref: [P]             float32 (flat embedding table, SMEM)
    # out_ref:    [row_tile, 128] float32 (VMEM)
    ids = ids_ref[...]
    P = weight_ref.shape[0]

    # Scalar gather as an unrolled VPU select chain (embedding_dim == 1):
    # avoids the one-hot materialization and the narrow MXU matmul entirely.
    def body(p, acc):
        return jnp.where(ids == p, weight_ref[p], acc)

    gathered = lax.fori_loop(0, P, body,
                             jnp.zeros(ids.shape, jnp.float32),
                             unroll=True)
    # TODO(synk): ids outside [0, P) silently yield exp(0) = 1 here, whereas
    # PyTorch's nn.Embedding would raise; clamp/validate upstream if needed.
    out_ref[...] = jnp.exp(gathered)          # EUP exp on a full lane-dense vreg


def scaling_id_random_forward(ids, weight):
    """ids: [B] int32, weight: [P, 1] float32 -> [B, 1] float32."""
    B = int(ids.shape[0])
    P, E = weight.shape
    assert E == 1
    w_flat = weight.reshape(P).astype(jnp.float32)   # 1-D for SMEM (no [P,1] padding blowup)

    # Lane-dense padding: ids live in [n_rows, 128] with n_rows a multiple of
    # the row tile (itself a multiple of 8 sublanes).
    n_rows = -(-B // _LANES)                          # ceil(B / 128)
    n_rows = -(-n_rows // _SUBLANES) * _SUBLANES      # multiple of 8
    row_tile = min(n_rows, _ROW_TILE)                 # both multiples of 8
    n_rows = -(-n_rows // row_tile) * row_tile        # multiple of row_tile
    total = n_rows * _LANES

    ids_flat = ids.astype(jnp.int32).reshape(-1)
    ids_padded = jnp.zeros((total,), jnp.int32).at[:B].set(ids_flat)  # pad with valid id 0
    ids_2d = ids_padded.reshape(n_rows, _LANES)

    out = pl.pallas_call(
        _embed_exp_kernel,
        out_shape=jax.ShapeDtypeStruct((n_rows, _LANES), jnp.float32),
        grid_spec=pltpu.PrefetchScalarGridSpec(
            num_scalar_prefetch=0,
            grid=(n_rows // row_tile,),
            in_specs=[
                pl.BlockSpec((row_tile, _LANES), lambda i: (i, 0)),
                # whole flat table lives in SMEM: cheap scalar-indexed reads,
                # no per-step DMA, no 127/128 lane waste.
                pl.BlockSpec(memory_space=pltpu.MemorySpace.SMEM),
            ],
            out_specs=pl.BlockSpec((row_tile, _LANES), lambda i: (i, 0)),
        ),
        compiler_params=pltpu.CompilerParams(
            dimension_semantics=("parallel",)),
    )(ids_2d, w_flat)

    # Strip padding and restore PyTorch's output shape: x.shape + (1,).
    return out.reshape(-1)[:B].reshape(B, 1)


if __name__ == "__main__":
    key = jax.random.PRNGKey(0)
    k_w, k_x = jax.random.split(key)

    num_participants = 16   # P
    batch = 8               # B (number of id lookups)

    # Deterministic init mirroring _initialize_weights: N(mean=-2.3, std=0.5)
    weight = (-2.3 + 0.5 * jax.random.normal(
        k_w, (num_participants, 1))).astype(jnp.float32)

    # x: participant ids
    x = jax.random.randint(k_x, (batch,), 0, num_participants, dtype=jnp.int32)

    out = scaling_id_random_forward(x, weight)
    out = jax.block_until_ready(out)

    # Reference check (plain JAX): exp(weight[x])
    ref = jnp.exp(weight[x])  # [B, 1]
    assert out.shape == (batch, 1), out.shape
    assert jnp.allclose(out, ref, rtol=1e-6, atol=1e-6), (out, ref)

    print("KERNEL_OK")
</pallas_src>

<mosaic_0001>
module attributes {stable_mosaic.version = 11 : i64} {
  func.func @_embed_exp_kernel(%arg0: i32, %arg1: memref<8x128xi32, #tpu.memory_space<vmem>>, %arg2: memref<16xf32, #tpu.memory_space<smem>>, %arg3: memref<8x128xf32, #tpu.memory_space<vmem>>) attributes {dimension_semantics = [#tpu.dimension_semantics<parallel>], iteration_bounds = array<i64: 1>, scalar_prefetch = 0 : i64, scratch_operands = 0 : i64, tpu.core_type = #tpu.core_type<tc>, window_params = [{transform_indices = @transform_0, window_bounds = array<i64: 8, 128>}, {transform_indices = @transform_1, window_bounds = array<i64: 16>}, {transform_indices = @transform_2, window_bounds = array<i64: 8, 128>}]} {
    %c0 = arith.constant 0 : index
    %c0_0 = arith.constant 0 : index
    %0 = vector.load %arg1[%c0, %c0_0] : memref<8x128xi32, #tpu.memory_space<vmem>>, vector<8x128xi32>
    %cst = arith.constant 0.000000e+00 : f32
    %1 = vector.broadcast %cst : f32 to vector<8x128xf32>
    %c0_i32 = arith.constant 0 : i32
    %2 = vector.broadcast %c0_i32 : i32 to vector<8x128xi32>
    %3 = arith.cmpi eq, %0, %2 : vector<8x128xi32>
    %4 = arith.index_cast %c0_i32 : i32 to index
    %5 = memref.load %arg2[%4] : memref<16xf32, #tpu.memory_space<smem>>
    %6 = vector.broadcast %5 : f32 to vector<8x128xf32>
    %7 = arith.select %3, %6, %1 : vector<8x128xi1>, vector<8x128xf32>
    %c1_i32 = arith.constant 1 : i32
    %8 = vector.broadcast %c1_i32 : i32 to vector<8x128xi32>
    %9 = arith.cmpi eq, %0, %8 : vector<8x128xi32>
    %10 = arith.index_cast %c1_i32 : i32 to index
    %11 = memref.load %arg2[%10] : memref<16xf32, #tpu.memory_space<smem>>
    %12 = vector.broadcast %11 : f32 to vector<8x128xf32>
    %13 = arith.select %9, %12, %7 : vector<8x128xi1>, vector<8x128xf32>
    %c2_i32 = arith.constant 2 : i32
    %14 = vector.broadcast %c2_i32 : i32 to vector<8x128xi32>
    %15 = arith.cmpi eq, %0, %14 : vector<8x128xi32>
    %16 = arith.index_cast %c2_i32 : i32 to index
    %17 = memref.load %arg2[%16] : memref<16xf32, #tpu.memory_space<smem>>
    %18 = vector.broadcast %17 : f32 to vector<8x128xf32>
    %19 = arith.select %15, %18, %13 : vector<8x128xi1>, vector<8x128xf32>
    %c3_i32 = arith.constant 3 : i32
    %20 = vector.broadcast %c3_i32 : i32 to vector<8x128xi32>
    %21 = arith.cmpi eq, %0, %20 : vector<8x128xi32>
    %22 = arith.index_cast %c3_i32 : i32 to index
    %23 = memref.load %arg2[%22] : memref<16xf32, #tpu.memory_space<smem>>
    %24 = vector.broadcast %23 : f32 to vector<8x128xf32>
    %25 = arith.select %21, %24, %19 : vector<8x128xi1>, vector<8x128xf32>
    %c4_i32 = arith.constant 4 : i32
    %26 = vector.broadcast %c4_i32 : i32 to vector<8x128xi32>
    %27 = arith.cmpi eq, %0, %26 : vector<8x128xi32>
    %28 = arith.index_cast %c4_i32 : i32 to index
    %29 = memref.load %arg2[%28] : memref<16xf32, #tpu.memory_space<smem>>
    %30 = vector.broadcast %29 : f32 to vector<8x128xf32>
    %31 = arith.select %27, %30, %25 : vector<8x128xi1>, vector<8x128xf32>
    %c5_i32 = arith.constant 5 : i32
    %32 = vector.broadcast %c5_i32 : i32 to vector<8x128xi32>
    %33 = arith.cmpi eq, %0, %32 : vector<8x128xi32>
    %34 = arith.index_cast %c5_i32 : i32 to index
    %35 = memref.load %arg2[%34] : memref<16xf32, #tpu.memory_space<smem>>
    %36 = vector.broadcast %35 : f32 to vector<8x128xf32>
    %37 = arith.select %33, %36, %31 : vector<8x128xi1>, vector<8x128xf32>
    %c6_i32 = arith.constant 6 : i32
    %38 = vector.broadcast %c6_i32 : i32 to vector<8x128xi32>
    %39 = arith.cmpi eq, %0, %38 : vector<8x128xi32>
    %40 = arith.index_cast %c6_i32 : i32 to index
    %41 = memref.load %arg2[%40] : memref<16xf32, #tpu.memory_space<smem>>
    %42 = vector.broadcast %41 : f32 to vector<8x128xf32>
    %43 = arith.select %39, %42, %37 : vector<8x128xi1>, vector<8x128xf32>
    %c7_i32 = arith.constant 7 : i32
    %44 = vector.broadcast %c7_i32 : i32 to vector<8x128xi32>
    %45 = arith.cmpi eq, %0, %44 : vector<8x128xi32>
    %46 = arith.index_cast %c7_i32 : i32 to index
    %47 = memref.load %arg2[%46] : memref<16xf32, #tpu.memory_space<smem>>
    %48 = vector.broadcast %47 : f32 to vector<8x128xf32>
    %49 = arith.select %45, %48, %43 : vector<8x128xi1>, vector<8x128xf32>
    %c8_i32 = arith.constant 8 : i32
    %50 = vector.broadcast %c8_i32 : i32 to vector<8x128xi32>
    %51 = arith.cmpi eq, %0, %50 : vector<8x128xi32>
    %52 = arith.index_cast %c8_i32 : i32 to index
    %53 = memref.load %arg2[%52] : memref<16xf32, #tpu.memory_space<smem>>
    %54 = vector.broadcast %53 : f32 to vector<8x128xf32>
    %55 = arith.select %51, %54, %49 : vector<8x128xi1>, vector<8x128xf32>
    %c9_i32 = arith.constant 9 : i32
    %56 = vector.broadcast %c9_i32 : i32 to vector<8x128xi32>
    %57 = arith.cmpi eq, %0, %56 : vector<8x128xi32>
    %58 = arith.index_cast %c9_i32 : i32 to index
    %59 = memref.load %arg2[%58] : memref<16xf32, #tpu.memory_space<smem>>
    %60 = vector.broadcast %59 : f32 to vector<8x128xf32>
    %61 = arith.select %57, %60, %55 : vector<8x128xi1>, vector<8x128xf32>
    %c10_i32 = arith.constant 10 : i32
    %62 = vector.broadcast %c10_i32 : i32 to vector<8x128xi32>
    %63 = arith.cmpi eq, %0, %62 : vector<8x128xi32>
    %64 = arith.index_cast %c10_i32 : i32 to index
    %65 = memref.load %arg2[%64] : memref<16xf32, #tpu.memory_space<smem>>
    %66 = vector.broadcast %65 : f32 to vector<8x128xf32>
    %67 = arith.select %63, %66, %61 : vector<8x128xi1>, vector<8x128xf32>
    %c11_i32 = arith.constant 11 : i32
    %68 = vector.broadcast %c11_i32 : i32 to vector<8x128xi32>
    %69 = arith.cmpi eq, %0, %68 : vector<8x128xi32>
    %70 = arith.index_cast %c11_i32 : i32 to index
    %71 = memref.load %arg2[%70] : memref<16xf32, #tpu.memory_space<smem>>
    %72 = vector.broadcast %71 : f32 to vector<8x128xf32>
    %73 = arith.select %69, %72, %67 : vector<8x128xi1>, vector<8x128xf32>
    %c12_i32 = arith.constant 12 : i32
    %74 = vector.broadcast %c12_i32 : i32 to vector<8x128xi32>
    %75 = arith.cmpi eq, %0, %74 : vector<8x128xi32>
    %76 = arith.index_cast %c12_i32 : i32 to index
    %77 = memref.load %arg2[%76] : memref<16xf32, #tpu.memory_space<smem>>
    %78 = vector.broadcast %77 : f32 to vector<8x128xf32>
    %79 = arith.select %75, %78, %73 : vector<8x128xi1>, vector<8x128xf32>
    %c13_i32 = arith.constant 13 : i32
    %80 = vector.broadcast %c13_i32 : i32 to vector<8x128xi32>
    %81 = arith.cmpi eq, %0, %80 : vector<8x128xi32>
    %82 = arith.index_cast %c13_i32 : i32 to index
    %83 = memref.load %arg2[%82] : memref<16xf32, #tpu.memory_space<smem>>
    %84 = vector.broadcast %83 : f32 to vector<8x128xf32>
    %85 = arith.select %81, %84, %79 : vector<8x128xi1>, vector<8x128xf32>
    %c14_i32 = arith.constant 14 : i32
    %86 = vector.broadcast %c14_i32 : i32 to vector<8x128xi32>
    %87 = arith.cmpi eq, %0, %86 : vector<8x128xi32>
    %88 = arith.index_cast %c14_i32 : i32 to index
    %89 = memref.load %arg2[%88] : memref<16xf32, #tpu.memory_space<smem>>
    %90 = vector.broadcast %89 : f32 to vector<8x128xf32>
    %91 = arith.select %87, %90, %85 : vector<8x128xi1>, vector<8x128xf32>
    %c15_i32 = arith.constant 15 : i32
    %92 = vector.broadcast %c15_i32 : i32 to vector<8x128xi32>
    %93 = arith.cmpi eq, %0, %92 : vector<8x128xi32>
    %94 = arith.index_cast %c15_i32 : i32 to index
    %95 = memref.load %arg2[%94] : memref<16xf32, #tpu.memory_space<smem>>
    %96 = vector.broadcast %95 : f32 to vector<8x128xf32>
    %97 = arith.select %93, %96, %91 : vector<8x128xi1>, vector<8x128xf32>
    %c16_i32 = arith.constant 16 : i32
    %98 = math.exp %97 : vector<8x128xf32>
    %c0_1 = arith.constant 0 : index
    %c0_2 = arith.constant 0 : index
    %99 = vector.load %arg3[%c0_1, %c0_2] : memref<8x128xf32, #tpu.memory_space<vmem>>, vector<8x128xf32>
    tpu.vector_store %arg3[%c0_1, %c0_2], %98 {strides = array<i32>} : memref<8x128xf32, #tpu.memory_space<vmem>>, vector<8x128xf32>,
    return
  }
  func.func @transform_0(%arg0: i32) -> (i32, i32) {
    %c0_i32 = arith.constant 0 : i32
    %c0_i32_0 = arith.constant 0 : i32
    return %arg0, %c0_i32 : i32, i32
  }
  func.func @transform_1(%arg0: i32) -> i32 {
    %c0_i32 = arith.constant 0 : i32
    %c0_i32_0 = arith.constant 0 : i32
    return %c0_i32 : i32
  }
  func.func @transform_2(%arg0: i32) -> (i32, i32) {
    %c0_i32 = arith.constant 0 : i32
    %c0_i32_0 = arith.constant 0 : i32
    return %arg0, %c0_i32 : i32, i32
  }
}

</mosaic_0001>

<bundles_post_ra>
// kernel: tpu_custom_call.1
= control target key start
LH: loop header
LB: loop body
LE: loop exit
PB: predicated region body
PF: predicated region fallthrough
CT: control target
= control target key end

     0   :  { %7 = vsyncpa [#allocation3], 0  ;;  %s256_s0 = inlined_call_operand.hbm [shape: s32[8,128], index: 0, kind: input, shape index: {}]   ;;  %s257_s1 = inlined_call_operand.hbm [shape: f32[16], index: 1, kind: input, shape index: {}]   ;;  %s258_s2 = inlined_call_operand.hbm [shape: f32[8,128], index: 2, kind: output, shape index: {}]  }
   0x1   :  { %8 = vsyncpa [#allocation5], 0 }
   0x2   :  { %9 = vsyncpa [#allocation4], 0  ;;  %s15_s11 = sshll.u32 %s256_s0, 4  ;;  %s211_s12 = smov [#allocation2]   ;;  %s16_s11 = int_to_ptr.hbm [resolvable:$true] %s15_s11 }
   0x3   :  { %s17_s13 = sshll.u32 %s211_s12, 4  ;;  %s26_s16 = sshll.u32 %s257_s1, 4  ;;  %s18_s13 = int_to_ptr.vmem [resolvable:$true] %s17_s13  ;;  %s27_s16 = int_to_ptr.hbm [resolvable:$true] %s26_s16 }
   0x4   :  { %20 = dma.hbm_to_vmem [thread:$0]  %s16_s11, 128, %s18_s13, [#allocation3]  }
   0x5   :  { %s212_s17 = smov [#allocation6]  }
   0x6   :  { %29 = dma.hbm_to_smem %s27_s16, 16, %s212_s17, [#allocation5]  }
   0x7   :  { %205 = dma.done.wait [#allocation3], 128  }
   0x8   :  { %206 = vsyncadd [#allocation3], 4294967168 }
   0x9   :  { %207 = dma.done.wait [#allocation5], 16  }
   0xa   :  { %208 = vsyncadd [#allocation5], 4294967280 }
   0xb   :  { %38 = sfence }
   0xc   :  { %s41_s18 = sld [smem:[#allocation6]]  ;;  %v235_v0 = vld [vmem:[#allocation2] sm:$0xff]  ;;  %s213_s4 = smov [#allocation7]  }
   0xd   :  { %s125_s0 = sld [smem:[#allocation6 + $0x1]]  ;;  %vm40_vm0 = vcmp.eq.s32.totalorder %v235_v0, 0  ;;  %vm44_vm1 = vcmp.eq.s32.totalorder %v235_v0, 1  ;;  %vm48_vm2 = vcmp.eq.s32.totalorder %v235_v0, 2  ;;  %vm52_vm3 = vcmp.eq.s32.totalorder %v235_v0, 3  ;;  %s112_s5 = sshll.u32 %s213_s4, 4  ;;  %s113_s5 = int_to_ptr.vmem [resolvable:$true] %s112_s5 }
   0xe   :  { %s126_s19 = sld [smem:[#allocation6 + $0x2]]  ;;  %vm56_vm4 = vcmp.eq.s32.totalorder %v235_v0, 4  ;;  %vm60_vm5 = vcmp.eq.s32.totalorder %v235_v0, 5  ;;  %vm64_vm6 = vcmp.eq.s32.totalorder %v235_v0, 6  ;;  %vm68_vm7 = vcmp.eq.s32.totalorder %v235_v0, 7  ;;  %s114_s8 = sshll.u32 %s258_s2, 4  ;;  %s115_s8 = int_to_ptr.hbm [resolvable:$true] %s114_s8 }
   0xf   :  { %s127_s20 = sld [smem:[#allocation6 + $0x3]]  ;;  %vm72_vm8 = vcmp.eq.s32.totalorder %v235_v0, 8  ;;  %vm76_vm9 = vcmp.eq.s32.totalorder %v235_v0, 9  ;;  %vm80_vm10 = vcmp.eq.s32.totalorder %v235_v0, 10  ;;  %vm84_vm11 = vcmp.eq.s32.totalorder %v235_v0, 11 }
  0x10   :  { %s128_s21 = sld [smem:[#allocation6 + $0x4]]  ;;  %vm88_vm12 = vcmp.eq.s32.totalorder %v235_v0, 12  ;;  %vm92_vm13 = vcmp.eq.s32.totalorder %v235_v0, 13  ;;  %vm96_vm14 = vcmp.eq.s32.totalorder %v235_v0, 14  ;;  %vm100_vm15 = vcmp.eq.s32.totalorder %v235_v0, 15 }
  0x11   :  { %s129_s1 = sld [smem:[#allocation6 + $0x5]] }
  0x12   :  { %v42_v1 = vstv %s41_s18  ;;  %s130_s22 = sld [smem:[#allocation6 + $0x6]] }
  0x13   :  { %v43_v2 = vsel %vm40_vm0, %v42_v1, 0.0  ;;  %v46_v3 = vstv %s125_s0  ;;  %s131_s23 = sld [smem:[#allocation6 + $0x7]] }
  0x14   :  { %v47_v4 = vsel %vm44_vm1, %v46_v3, %v43_v2  ;;  %v50_v5 = vstv %s126_s19  ;;  %s132_s24 = sld [smem:[#allocation6 + $0x8]] }
  0x15   :  { %v51_v6 = vsel %vm48_vm2, %v50_v5, %v47_v4  ;;  %v54_v7 = vstv %s127_s20  ;;  %s133_s25 = sld [smem:[#allocation6 + $0x9]] }
  0x16   :  { %v55_v8 = vsel %vm52_vm3, %v54_v7, %v51_v6  ;;  %v58_v9 = vstv %s128_s21  ;;  %s134_s26 = sld [smem:[#allocation6 + $0xa]] }
  0x17   :  { %v59_v10 = vsel %vm56_vm4, %v58_v9, %v55_v8  ;;  %v62_v11 = vstv %s129_s1  ;;  %s135_s27 = sld [smem:[#allocation6 + $0xb]] }
  0x18   :  { %v63_v12 = vsel %vm60_vm5, %v62_v11, %v59_v10  ;;  %v66_v13 = vstv %s130_s22  ;;  %s136_s28 = sld [smem:[#allocation6 + $0xc]] }
  0x19   :  { %v67_v14 = vsel %vm64_vm6, %v66_v13, %v63_v12  ;;  %v70_v15 = vstv %s131_s23  ;;  %s137_s29 = sld [smem:[#allocation6 + $0xd]] }
  0x1a   :  { %v71_v16 = vsel %vm68_vm7, %v70_v15, %v67_v14  ;;  %v74_v17 = vstv %s132_s24  ;;  %s138_s30 = sld [smem:[#allocation6 + $0xe]] }
  0x1b   :  { %v75_v18 = vsel %vm72_vm8, %v74_v17, %v71_v16  ;;  %v78_v19 = vstv %s133_s25  ;;  %s139_s3 = sld [smem:[#allocation6 + $0xf]] }
  0x1c   :  { %v79_v20 = vsel %vm76_vm9, %v78_v19, %v75_v18  ;;  %v82_v21 = vstv %s134_s26 }
  0x1d   :  { %v83_v22 = vsel %vm80_vm10, %v82_v21, %v79_v20  ;;  %v86_v23 = vstv %s135_s27 }
  0x1e   :  { %v87_v24 = vsel %vm84_vm11, %v86_v23, %v83_v22  ;;  %v90_v25 = vstv %s136_s28 }
  0x1f   :  { %v91_v26 = vsel %vm88_vm12, %v90_v25, %v87_v24  ;;  %v94_v27 = vstv %s137_s29 }
  0x20   :  { %v95_v28 = vsel %vm92_vm13, %v94_v27, %v91_v26  ;;  %v98_v29 = vstv %s138_s30 }
  0x21   :  { %v99_v30 = vsel %vm96_vm14, %v98_v29, %v95_v28  ;;  %v102_v31 = vstv %s139_s3 }
  0x22   :  { %v103_v32 = vsel %vm100_vm15, %v102_v31, %v99_v30 }
  0x23   :  { %v104_v33 = vmul.f32 1.442695, %v103_v32 }
  0x25   :  { %143 = vpow2.f32 %v104_v33 }
  0x2b   :  { %v144_v34 = vpop.eup %143 }
  0x2c   :  { %106 = vst [vmem:[#allocation7] sm:$0xff] %v144_v34 }
  0x2d   :  { %117 = dma.vmem_to_hbm [thread:$0]  %s113_s5, 128, %s115_s8, [#allocation4]  }
  0x2e   :  { %209 = dma.done.wait [#allocation4], 128  }
  0x2f   :  { %210 = vsyncadd [#allocation4], 4294967168 }
  0x30   :  { %122 = vsyncpa [#allocation3], 1 }
  0x31   :  { %123 = vsyncpa [#allocation4], 1 }
  0x32   :  { %124 = vsyncpa [#allocation5], 1 }

</bundles_post_ra>
